<compile_context>
chip_gen: v5e
topology: v5e:2x2
jax: 0.10.0
libtpu: 0.0.40
codegen_flags: <defaults>
</compile_context>

<pallas_src>
import jax
import jax.numpy as jnp
from jax.experimental import pallas as pl
from jax.experimental.pallas import tpu as pltpu

# ---------------- dimensions (small, consistent with the module) ------------
B, T = 2, 8                       # batch, sequence
STATE_DIM, GOAL_DIM = 10, 6
IN_DIM = STATE_DIM + GOAL_DIM     # 16
HIDDEN_ENC = 32
EMBED_DIM = 32                    # obs_encoder output dim
LATENT_DIM = 16                   # CVAE latent dim
HIDDEN_DEC = 64
ACTION_DIM = 8

# packed activation slab: [state | goal | z] -> (N, X_DIM)
X_DIM = IN_DIM + LATENT_DIM       # 32

# packed weight/bias slab: all blocks padded to P = 64 lanes, 16-row-aligned starts
P = HIDDEN_DEC                    # 64
R_W1, R_W3B, R_W23, R_W4, R_BIAS = 0, 32, 64, 128, 192
W_SLAB_ROWS = 208                 # rows 195:208 are padding


# ---------------- fused forward kernel (single invocation, all in VMEM) -----
def cvae_fused_kernel(x_ref, w_ref, out_ref):
    x = x_ref[...]                                               # (N, 32) bf16
    # static ref-view slices of the packed weight slab (free)
    w1p = w_ref[R_W1:R_W1 + X_DIM, :]                            # (32, 64) bf16
    w3bp = w_ref[R_W3B:R_W3B + X_DIM, :]                         # (32, 64) bf16
    w23p = w_ref[R_W23:R_W23 + P, :]                             # (64, 64) bf16
    w4p = w_ref[R_W4:R_W4 + P, :]                                # (64, 64) bf16
    biases = w_ref[R_BIAS:R_BIAS + 8, :].astype(jnp.float32)     # (8, 64) f32
    b1, b23, b4 = biases[0:1, :], biases[1:2, :], biases[2:3, :]

    # obs_encoder Linear-1 on concat([state, goal]); z rows of w1p are zero.
    h1 = jnp.maximum(
        jnp.dot(x, w1p, preferred_element_type=jnp.float32) + b1, 0.0)       # (N,64) f32
    # folded encoder-Linear2 @ decoder-Linear1 plus decoder z slice:
    #   h2 = relu(h1 @ (W2@W3a) + z @ W3b + (b2@W3a + b3))
    h2 = jnp.maximum(
        jnp.dot(h1.astype(jnp.bfloat16), w23p, preferred_element_type=jnp.float32)
        + jnp.dot(x, w3bp, preferred_element_type=jnp.float32)
        + b23, 0.0)                                                          # (N,64) f32
    # decoder output head; only lanes 0:ACTION_DIM of w4p/b4 are non-zero.
    out = jnp.dot(h2.astype(jnp.bfloat16), w4p, preferred_element_type=jnp.float32) + b4
    out_ref[...] = out[:, :ACTION_DIM]


# ---------------- one-time parameter fold + pack (NOT on the per-call path) -
def pack_params(params):
    """Fold encoder-L2 into decoder-L1 and pack all weights/biases into one bf16 slab.

    Both concats ([state, goal] and [obs, z]) become zero-padded weight blocks, so the
    kernel needs no concatenation ops and only a single weight DMA.
    """
    (w1, b1, w2, b2, w3a, w3b, b3, w4, b4) = params
    w23 = w2 @ w3a                      # (HIDDEN_ENC, HIDDEN_DEC), exact fold
    b23 = b2 @ w3a + b3                 # (1, HIDDEN_DEC)

    slab = jnp.zeros((W_SLAB_ROWS, P), jnp.float32)
    # layer-1 weight acting on packed x: rows 0:16 <- W1, rows 16:32 (z part) stay 0
    slab = slab.at[R_W1:R_W1 + IN_DIM, :HIDDEN_ENC].set(w1)
    # decoder z-slice weight: z occupies cols 16:32 of x, so rows 16:32 of this block
    slab = slab.at[R_W3B + IN_DIM:R_W3B + X_DIM, :HIDDEN_DEC].set(w3b)
    # folded encoder-L2 @ decoder-L1 (h1's zero-padded cols 32:64 hit zero rows)
    slab = slab.at[R_W23:R_W23 + HIDDEN_ENC, :HIDDEN_DEC].set(w23)
    # output head
    slab = slab.at[R_W4:R_W4 + HIDDEN_DEC, :ACTION_DIM].set(w4)
    # bias rows
    slab = slab.at[R_BIAS + 0, :HIDDEN_ENC].set(b1[0])
    slab = slab.at[R_BIAS + 1, :HIDDEN_DEC].set(b23[0])
    slab = slab.at[R_BIAS + 2, :ACTION_DIM].set(b4[0])
    return slab.astype(jnp.bfloat16)


# ---------------- jitted per-call wrapper ------------------------------------
@jax.jit
def cvae_policy_forward(state, goal, z, w_slab):
    """state (B,T,10), goal (B,T,6), z (B,T,16); w_slab from pack_params()."""
    Bx, Tx, _ = state.shape
    N = Bx * Tx
    x = jnp.concatenate(
        [state.reshape(N, STATE_DIM),
         goal.reshape(N, GOAL_DIM),
         z.reshape(N, LATENT_DIM)], axis=-1).astype(jnp.bfloat16)   # (N, 32) bf16

    vmem = pl.BlockSpec(memory_space=pltpu.MemorySpace.VMEM)
    out = pl.pallas_call(
        cvae_fused_kernel,
        out_shape=jax.ShapeDtypeStruct((N, ACTION_DIM), jnp.float32),
        in_specs=[vmem, vmem],          # whole arrays VMEM-resident, single step
        out_specs=vmem,
    )(x, w_slab)
    return out.reshape(Bx, Tx, ACTION_DIM)


# ---------------- pure-JAX reference (original, unfolded, f32 semantics) ----
def reference_forward(state, goal, z, params):
    (w1, b1, w2, b2, w3a, w3b, b3, w4, b4) = params
    x = jnp.concatenate([state, goal], axis=-1).reshape(-1, IN_DIM)
    zz = z.reshape(-1, LATENT_DIM)
    h1 = jnp.maximum(x @ w1 + b1, 0.0)
    obs = h1 @ w2 + b2
    h2 = jnp.maximum(obs @ w3a + zz @ w3b + b3, 0.0)
    return (h2 @ w4 + b4).reshape(state.shape[0], state.shape[1], ACTION_DIM)


# ---------------- deterministic parameter init ------------------------------
def init_params(key):
    ks = jax.random.split(key, 9)

    def lin(k, fan_in, fan_out):
        scale = 1.0 / jnp.sqrt(jnp.float32(fan_in))
        return jax.random.uniform(k, (fan_in, fan_out), jnp.float32, -scale, scale)

    w1 = lin(ks[0], IN_DIM, HIDDEN_ENC)
    b1 = jax.random.uniform(ks[1], (1, HIDDEN_ENC), jnp.float32, -0.1, 0.1)
    w2 = lin(ks[2], HIDDEN_ENC, EMBED_DIM)
    b2 = jax.random.uniform(ks[3], (1, EMBED_DIM), jnp.float32, -0.1, 0.1)
    w3a = lin(ks[4], EMBED_DIM, HIDDEN_DEC)           # decoder weight, obs slice
    w3b = lin(ks[5], LATENT_DIM, HIDDEN_DEC)          # decoder weight, z slice
    b3 = jax.random.uniform(ks[6], (1, HIDDEN_DEC), jnp.float32, -0.1, 0.1)
    w4 = lin(ks[7], HIDDEN_DEC, ACTION_DIM)
    b4 = jax.random.uniform(ks[8], (1, ACTION_DIM), jnp.float32, -0.1, 0.1)
    return (w1, b1, w2, b2, w3a, w3b, b3, w4, b4)


if __name__ == "__main__":
    key = jax.random.PRNGKey(0)
    k_state, k_goal, k_z, k_params = jax.random.split(key, 4)

    state = jax.random.normal(k_state, (B, T, STATE_DIM), jnp.float32)
    goal = jax.random.normal(k_goal, (B, T, GOAL_DIM), jnp.float32)
    # TODO(synk): model.predict samples fresh prior noise every call; the fixed key
    # here is only for a deterministic test harness.
    z = jax.random.normal(k_z, (B, T, LATENT_DIM), jnp.float32)

    params = init_params(k_params)
    w_slab = pack_params(params)            # one-time fold + pack, off the call path

    pred = cvae_policy_forward(state, goal, z, w_slab)
    jax.block_until_ready(pred)

    ref = reference_forward(state, goal, z, params)
    assert pred.shape == (B, T, ACTION_DIM)
    # bf16 matmul operands (f32 accumulation) vs f32 reference -> ~1e-2-scale tolerance
    assert jnp.allclose(pred, ref, atol=5e-2, rtol=5e-2), float(jnp.max(jnp.abs(pred - ref)))

    print("KERNEL_OK")
</pallas_src>

<mosaic_0001>
module attributes {stable_mosaic.version = 11 : i64} {
  func.func @cvae_fused_kernel(%arg0: memref<16x32xbf16, #tpu.memory_space<vmem>>, %arg1: memref<208x64xbf16, #tpu.memory_space<vmem>>, %arg2: memref<16x8xf32, #tpu.memory_space<vmem>>) attributes {dimension_semantics = [], scalar_prefetch = 0 : i64, scratch_operands = 0 : i64, tpu.core_type = #tpu.core_type<tc>} {
    %c0 = arith.constant 0 : index
    %c0_0 = arith.constant 0 : index
    %0 = vector.load %arg0[%c0, %c0_0] : memref<16x32xbf16, #tpu.memory_space<vmem>>, vector<16x32xbf16>
    %c0_1 = arith.constant 0 : index
    %c0_2 = arith.constant 0 : index
    %1 = vector.load %arg1[%c0_1, %c0_2] : memref<208x64xbf16, #tpu.memory_space<vmem>>, vector<32x64xbf16>
    %c32 = arith.constant 32 : index
    %c0_3 = arith.constant 0 : index
    %2 = vector.load %arg1[%c32, %c0_3] : memref<208x64xbf16, #tpu.memory_space<vmem>>, vector<32x64xbf16>
    %c64 = arith.constant 64 : index
    %c0_4 = arith.constant 0 : index
    %3 = vector.load %arg1[%c64, %c0_4] : memref<208x64xbf16, #tpu.memory_space<vmem>>, vector<64x64xbf16>
    %c128 = arith.constant 128 : index
    %c0_5 = arith.constant 0 : index
    %4 = vector.load %arg1[%c128, %c0_5] : memref<208x64xbf16, #tpu.memory_space<vmem>>, vector<64x64xbf16>
    %c192 = arith.constant 192 : index
    %c0_6 = arith.constant 0 : index
    %5 = vector.load %arg1[%c192, %c0_6] : memref<208x64xbf16, #tpu.memory_space<vmem>>, vector<8x64xbf16>
    %6 = arith.extf %5 : vector<8x64xbf16> to vector<8x64xf32>
    %7 = vector.extract_strided_slice %6 {offsets = [0, 0], sizes = [1, 64], strides = [1, 1]} : vector<8x64xf32> to vector<1x64xf32>
    %8 = vector.extract_strided_slice %6 {offsets = [1, 0], sizes = [1, 64], strides = [1, 1]} : vector<8x64xf32> to vector<1x64xf32>
    %9 = vector.extract_strided_slice %6 {offsets = [2, 0], sizes = [1, 64], strides = [1, 1]} : vector<8x64xf32> to vector<1x64xf32>
    %cst = arith.constant dense<0.000000e+00> : vector<16x64xf32>
    %10 = tpu.matmul %0, %1, %cst {dimension_numbers = #tpu.dot_dimension_numbers<[1], [0], [0], [1], [0, 0, 1, 1], [], []>} : vector<16x32xbf16>, vector<32x64xbf16>, vector<16x64xf32> -> vector<16x64xf32>
    %11 = vector.broadcast %7 : vector<1x64xf32> to vector<16x64xf32>
    %12 = arith.addf %10, %11 : vector<16x64xf32>
    %cst_7 = arith.constant 0.000000e+00 : f32
    %13 = vector.broadcast %cst_7 : f32 to vector<16x64xf32>
    %14 = arith.maximumf %12, %13 : vector<16x64xf32>
    %15 = arith.truncf %14 : vector<16x64xf32> to vector<16x64xbf16>
    %cst_8 = arith.constant dense<0.000000e+00> : vector<16x64xf32>
    %16 = tpu.matmul %15, %3, %cst_8 {dimension_numbers = #tpu.dot_dimension_numbers<[1], [0], [0], [1], [0, 0, 1, 1], [], []>} : vector<16x64xbf16>, vector<64x64xbf16>, vector<16x64xf32> -> vector<16x64xf32>
    %cst_9 = arith.constant dense<0.000000e+00> : vector<16x64xf32>
    %17 = tpu.matmul %0, %2, %cst_9 {dimension_numbers = #tpu.dot_dimension_numbers<[1], [0], [0], [1], [0, 0, 1, 1], [], []>} : vector<16x32xbf16>, vector<32x64xbf16>, vector<16x64xf32> -> vector<16x64xf32>
    %18 = arith.addf %16, %17 : vector<16x64xf32>
    %19 = vector.broadcast %8 : vector<1x64xf32> to vector<16x64xf32>
    %20 = arith.addf %18, %19 : vector<16x64xf32>
    %cst_10 = arith.constant 0.000000e+00 : f32
    %21 = vector.broadcast %cst_10 : f32 to vector<16x64xf32>
    %22 = arith.maximumf %20, %21 : vector<16x64xf32>
    %23 = arith.truncf %22 : vector<16x64xf32> to vector<16x64xbf16>
    %cst_11 = arith.constant dense<0.000000e+00> : vector<16x64xf32>
    %24 = tpu.matmul %23, %4, %cst_11 {dimension_numbers = #tpu.dot_dimension_numbers<[1], [0], [0], [1], [0, 0, 1, 1], [], []>} : vector<16x64xbf16>, vector<64x64xbf16>, vector<16x64xf32> -> vector<16x64xf32>
    %25 = vector.broadcast %9 : vector<1x64xf32> to vector<16x64xf32>
    %26 = arith.addf %24, %25 : vector<16x64xf32>
    %27 = vector.extract_strided_slice %26 {offsets = [0, 0], sizes = [16, 8], strides = [1, 1]} : vector<16x64xf32> to vector<16x8xf32>
    %c0_12 = arith.constant 0 : index
    %c0_13 = arith.constant 0 : index
    %28 = vector.load %arg2[%c0_12, %c0_13] : memref<16x8xf32, #tpu.memory_space<vmem>>, vector<16x8xf32>
    tpu.vector_store %arg2[%c0_12, %c0_13], %27 {strides = array<i32>} : memref<16x8xf32, #tpu.memory_space<vmem>>, vector<16x8xf32>,
    return
  }
}

</mosaic_0001>

<bundles_post_ra>
// kernel: cvae_policy_forward.1
= control target key start
LH: loop header
LB: loop body
LE: loop exit
PB: predicated region body
PF: predicated region fallthrough
CT: control target
= control target key end

     0   :  { %s380_s0 = inlined_call_operand.vmem [shape: bf16[16,32], index: 0, kind: input, shape index: {}]   ;;  %s381_s1 = inlined_call_operand.vmem [shape: bf16[208,64], index: 1, kind: input, shape index: {}]   ;;  %s382_s2 = inlined_call_operand.hbm [shape: f32[16,8], index: 2, kind: output, shape index: {}]  }
   0x1   :  { %v275_v0 = vld [vmem:[%s381_s1 + $0x8] sm:$0xff] }
   0x2   :  { %7 = vsyncpa [#allocation3], 0  ;;  %69 = vmatpush.bf16.msra.mxu0 %v275_v0  ;;  %v274_v1 = vld [vmem:[%s381_s1] sm:$0xff]  ;;  %vm59_vm0 = vcmask 261120   ;;  %v281_v3 = vld [vmem:[%s381_s1 + $0x38] sm:$0xff]  ;;  %vm130_vm1 = vcmask 523264  }
   0x3   :  { %v273_v2 = vld [vmem:[%s380_s0] sm:$0xff]  ;;  %138 = vmatpush.bf16.msra.mxu2 %v281_v3  ;;  %v280_v4 = vld [vmem:[%s381_s1 + $0x30] sm:$0xff]  ;;  %v277_v5 = vld [vmem:[%s381_s1 + $0x18] sm:$0xff]  ;;  %vm196_vm2 = vcmask 64512   ;;  %s205_s11 = sshll.u32 %s382_s2, 4  ;;  %s316_s12 = smov 128   ;;  %s206_s11 = int_to_ptr.hbm [resolvable:$true] %s205_s11 }
   0x4   :  { %98 = vmatpush.bf16.msra.mxu1 %v277_v5  ;;  %v279_v6 = vld [vmem:[%s381_s1 + $0x28] sm:$0xff]  ;;  %v276_v7 = vld [vmem:[%s381_s1 + $0x10] sm:$0xff]  ;;  %v278_v8 = vld [vmem:[%s381_s1 + $0x20] sm:$0xff]  ;;  %s317_s13 = smov 8  }
   0x5   :  { %v39_v9 = vld [vmem:[%s381_s1 + $0x60] sm:$0xf]  ;;  %v285_v19 = vld [vmem:[%s381_s1 + $0x58] sm:$0xff]  ;;  %v284_v20 = vld [vmem:[%s381_s1 + $0x50] sm:$0xff] }
   0x6   :  { %70 = vmatpush.bf16.msra.mxu0 %v274_v1  ;;  %v40_v10 = vunpack.c.l.bf16 %v39_v9  ;;  %186 = vmatpush.bf16.msra.mxu3 %v285_v19  ;;  %v283_v21 = vld [vmem:[%s381_s1 + $0x48] sm:$0xff]  ;;  %v282_v22 = vld [vmem:[%s381_s1 + $0x40] sm:$0xff]  ;;  %s315_s1 = smov [#allocation2]  }
   0x7   :  { %139 = vmatpush.bf16.msra.mxu2 %v280_v4  ;;  %s203_s8 = sshll.u32 %s315_s1, 4  ;;  %s204_s8 = int_to_ptr.vmem [resolvable:$true] %s203_s8 }
   0x8   :  { %99 = vmatpush.bf16.msra.mxu1 %v276_v7  ;;  %v41_v12 = vperm.slane %v40_v10, 0  ;;  %v148_v26 = vperm.slane %v40_v10, 1  ;;  %v154_v35 = vperm.slane %v40_v10, 2 }
   0x9   :  { %229 = vmatmul.msk.bf16.vlgmr.msra.gmra.mxu0 %vm59_vm0, %v273_v2 }
   0xa   :  { %187 = vmatpush.bf16.msra.mxu3 %v284_v20 }
   0xb   :  { %140 = vmatpush.bf16.msra.mxu2 %v279_v6  ;;  %238 = vmatmul.msk.bf16.vlgmr.msra.gmra.mxu1 %vm59_vm0, %v273_v2 }
   0xe   :  { %188 = vmatpush.bf16.msra.mxu3 %v283_v21 }
   0xf   :  { %141 = vmatpush.bf16.msra.mxu2 %v278_v8 }
  0x12   :  { %189 = vmatpush.bf16.msra.mxu3 %v282_v22 }
  0x86   :  { %v72_v11 = vpop.f32.mrf.mxu0 }
  0x87   :  { %v73_v13 = vadd.f32 %v72_v11, %v41_v12 }
  0x88   :  { %v101_v23 = vpop.f32.mrf.mxu1 }
  0x89   :  { %v77_v16 = vmax.f32 %v73_v13, 0.0 }
  0x8e   :  { %v74_v14 = vpop.f32.mrf.mxu0 }
  0x8f   :  { %v75_v15 = vadd.f32 %v74_v14, %v41_v12 }
  0x90   :  { %v103_v27 = vpop.f32.mrf.mxu1 }
  0x91   :  { %v78_v17 = vmax.f32 %v75_v15, 0.0 }
  0x93   :  { %v79_v18 = vpack.c.bf16 %v78_v17, %v77_v16 }
  0x95   :  { %255 = vmatmul.msk.bf16.vlgmr.msra.gmra.mxu2 %vm130_vm1, %v79_v18 }
 0x118   :  { %v143_v24 = vpop.f32.mrf.mxu2 }
 0x119   :  { %v144_v25 = vadd.f32 %v143_v24, %v101_v23 }
 0x11b   :  { %v149_v29 = vadd.f32 %v148_v26, %v144_v25 }
 0x11d   :  { %v151_v32 = vmax.f32 %v149_v29, 0.0 }
 0x120   :  { %v145_v28 = vpop.f32.mrf.mxu2 }
 0x121   :  { %v146_v30 = vadd.f32 %v145_v28, %v103_v27 }
 0x123   :  { %v150_v31 = vadd.f32 %v148_v26, %v146_v30 }
 0x125   :  { %v152_v33 = vmax.f32 %v150_v31, 0.0 }
 0x127   :  { %v153_v34 = vpack.c.bf16 %v152_v33, %v151_v32 }
 0x129   :  { %272 = vmatmul.msk.bf16.vlgmr.msra.gmra.mxu3 %vm130_vm1, %v153_v34 }
 0x1ac   :  { %v191_v36 = vpop.f32.mrf.mxu3 }
 0x1ad   :  { %v192_v37 = vadd.f32 %v191_v36, %v154_v35 }
 0x1af   :  { %197 = vst.msk [vmem:[#allocation2] sm:$0xff] %vm196_vm2, %v192_v37 }
 0x1b4   :  { %v193_v38 = vpop.f32.mrf.mxu3 }
 0x1b5   :  { %v194_v39 = vadd.f32 %v193_v38, %v154_v35 }
 0x1b7   :  { %198 = vst.msk [vmem:[#allocation2 + $0x8] sm:$0xff] %vm196_vm2, %v194_v39 }
 0x1b8   :  { %211 = dma.vmem_to_hbm [thread:$0]  %s204_s8, 256, %s206_s11, [#allocation3], %s316_s12, %s316_s12, %s317_s13  }
 0x1b9   :  { %313 = dma.done.wait [#allocation3], 256  }
 0x1ba   :  { %314 = vsyncadd [#allocation3], 4294967040 }
 0x1bb   :  { %216 = vsyncpa [#allocation3], 1 }

</bundles_post_ra>
